<compile_context>
chip_gen: v6e
topology: v6e:2x2x1
jax: 0.10.0
libtpu: 0.0.40
codegen_flags: <defaults>
</compile_context>

<pallas_src>
import jax
import jax.numpy as jnp
from jax import lax
from jax.experimental import pallas as pl
from jax.experimental.pallas import tpu as pltpu

BN_EPS = 1e-5


def _deconv_bn_relu_kernel(xcol_ref, w_ref, b_ref, o_ref):
    # xcol_ref: (K*K*Cin, tile_pix)  w_ref: (Cout, K*K*Cin)  b_ref: (Cout, 1)
    x = xcol_ref[...].astype(jnp.float32)
    w = w_ref[...].astype(jnp.float32)
    y = jnp.dot(w, x, preferred_element_type=jnp.float32)   # MXU, lane-dense output
    y = y + b_ref[...]                                       # bias broadcast over lanes
    o_ref[...] = jnp.maximum(y, 0.0).astype(o_ref.dtype)     # fused ReLU on the VPU


def _fold_bn(w, b, gamma, beta, mean, var, eps=BN_EPS):
    """Fold eval-mode BatchNorm2d into a ConvTranspose2d weight/bias.

    w: (Cin, Cout, K, K) PyTorch ConvTranspose2d layout; BN acts on Cout."""
    s = gamma / jnp.sqrt(var + eps)
    w_eff = w * s[None, :, None, None]
    b_eff = (b - mean) * s + beta
    return w_eff, b_eff


def deconv2d_batchnorm_relu(x, params, *, stride, padding, tile_pix=2048):
    """Forward of deconv2DBatchNormRelu. x: (N, Cin, H, W) -> (N, Cout, Hout, Wout)."""
    N, Cin, H, W = x.shape
    w = params["weight"]                      # (Cin, Cout, K, K)
    Cout, K = w.shape[1], w.shape[2]
    assert w.shape[0] == Cin and w.shape[3] == K
    assert tile_pix % 128 == 0

    Hout = (H - 1) * stride - 2 * padding + K
    Wout = (W - 1) * stride - 2 * padding + K

    # Fold eval-mode BN, then build the equivalent stride-1 conv weight:
    # flip spatially, flatten to (Cout, K*K*Cin), tap-major / channel-minor.
    w_eff, b_eff = _fold_bn(w, params["bias"], params["gamma"], params["beta"],
                            params["running_mean"], params["running_var"])
    wf = jnp.flip(w_eff, axis=(2, 3))                            # (Cin, Cout, K, K)
    wmat = jnp.transpose(wf, (1, 2, 3, 0)).reshape(Cout, K * K * Cin).astype(jnp.float32)
    bmat = b_eff.reshape(Cout, 1).astype(jnp.float32)

    # Dilate by the stride and pad by (K-1-padding) in a single lax.pad
    # (negative edge padding crops, covering padding > K-1).
    pd = K - 1 - padding
    xp = lax.pad(x, jnp.array(0, dtype=x.dtype),
                 [(0, 0, 0), (0, 0, 0),
                  (pd, pd, stride - 1), (pd, pd, stride - 1)])

    # Channel-major x-columns: (K*K*Cin, N*Hout*Wout), pixels on the lane axis.
    taps = [xp[:, :, u:u + Hout, v:v + Wout] for u in range(K) for v in range(K)]
    xcol = jnp.stack(taps, axis=1)                               # (N, K*K, Cin, Hout, Wout)
    xcol = xcol.reshape(N, K * K * Cin, Hout * Wout)
    xcol = jnp.transpose(xcol, (1, 0, 2)).reshape(K * K * Cin, N * Hout * Wout)

    M = N * Hout * Wout
    tile = min(tile_pix, pl.cdiv(M, 128) * 128)
    Mp = pl.cdiv(M, tile) * tile
    if Mp != M:                                                  # ragged pixel count
        xcol = jnp.pad(xcol, ((0, 0), (0, Mp - M)))

    out = pl.pallas_call(
        _deconv_bn_relu_kernel,
        out_shape=jax.ShapeDtypeStruct((Cout, Mp), x.dtype),
        grid_spec=pltpu.PrefetchScalarGridSpec(
            num_scalar_prefetch=0,
            grid=(Mp // tile,),
            in_specs=[
                pl.BlockSpec((K * K * Cin, tile), lambda i: (0, i)),   # streamed pixels
                pl.BlockSpec((Cout, K * K * Cin), lambda i: (0, 0)),   # VMEM-resident W
                pl.BlockSpec((Cout, 1), lambda i: (0, 0)),             # VMEM-resident b
            ],
            out_specs=pl.BlockSpec((Cout, tile), lambda i: (0, i)),
        ),
        compiler_params=pltpu.CompilerParams(
            dimension_semantics=("parallel",)),
    )(xcol, wmat, bmat)

    # (Cout, N*Hout*Wout) -> (N, Cout, Hout, Wout)
    out = out[:, :M].reshape(Cout, N, Hout, Wout)
    return jnp.transpose(out, (1, 0, 2, 3))


def reference_forward(x, params, *, stride, padding, eps=BN_EPS):
    """Pure-jnp reference: literal ConvTranspose2d scatter + eval-mode BN + ReLU."""
    w, b = params["weight"], params["bias"]
    Cin, Cout, K, _ = w.shape
    N, _, H, W = x.shape
    Hout = (H - 1) * stride - 2 * padding + K
    Wout = (W - 1) * stride - 2 * padding + K
    Hfull = (H - 1) * stride + K
    Wfull = (W - 1) * stride + K

    y = jnp.zeros((N, Cout, Hfull, Wfull), jnp.float32)
    for kh in range(K):
        for kw in range(K):
            contrib = jnp.einsum("nchw,co->nohw", x, w[:, :, kh, kw])
            y = y.at[:, :, kh:kh + (H - 1) * stride + 1:stride,
                           kw:kw + (W - 1) * stride + 1:stride].add(contrib)
    y = y[:, :, padding:padding + Hout, padding:padding + Wout]
    y = y + b[None, :, None, None]

    s = params["gamma"] / jnp.sqrt(params["running_var"] + eps)
    y = (y - params["running_mean"][None, :, None, None]) * s[None, :, None, None] \
        + params["beta"][None, :, None, None]
    return jnp.maximum(y, 0.0).astype(x.dtype)


def make_params(key, in_channels, n_filters, k_size):
    ks = jax.random.split(key, 6)
    return {
        # PyTorch ConvTranspose2d weight layout: (in_channels, out_channels, kH, kW)
        "weight": 0.1 * jax.random.normal(
            ks[0], (in_channels, n_filters, k_size, k_size), jnp.float32),
        "bias": 0.1 * jax.random.normal(ks[1], (n_filters,), jnp.float32),
        # eval-mode BatchNorm2d affine params + (non-trivial) running stats
        "gamma": 1.0 + 0.1 * jax.random.normal(ks[2], (n_filters,), jnp.float32),
        "beta": 0.1 * jax.random.normal(ks[3], (n_filters,), jnp.float32),
        "running_mean": 0.1 * jax.random.normal(ks[4], (n_filters,), jnp.float32),
        "running_var": 1.0 + 0.1 * jax.random.uniform(ks[5], (n_filters,), jnp.float32),
    }


if __name__ == "__main__":
    key = jax.random.PRNGKey(0)
    kx1, kp1, kx2, kp2 = jax.random.split(key, 4)

    # Config A: 2x upsampling deconv (k=2, s=2, p=0): (2,4,16,16) -> (2,8,32,32)
    xa = jax.random.normal(kx1, (2, 4, 16, 16), jnp.float32)
    pa = make_params(kp1, 4, 8, 2)
    out_a = jax.block_until_ready(
        deconv2d_batchnorm_relu(xa, pa, stride=2, padding=0, tile_pix=512))
    ref_a = jax.block_until_ready(reference_forward(xa, pa, stride=2, padding=0))
    assert out_a.shape == (2, 8, 32, 32), out_a.shape
    assert jnp.allclose(out_a, ref_a, atol=1e-3, rtol=1e-3), \
        float(jnp.max(jnp.abs(out_a - ref_a)))

    # Config B: linknet-style deconv (k=3, s=2, p=1): (2,8,16,16) -> (2,4,31,31)
    xb = jax.random.normal(kx2, (2, 8, 16, 16), jnp.float32)
    pb = make_params(kp2, 8, 4, 3)
    out_b = jax.block_until_ready(
        deconv2d_batchnorm_relu(xb, pb, stride=2, padding=1, tile_pix=512))
    ref_b = jax.block_until_ready(reference_forward(xb, pb, stride=2, padding=1))
    assert out_b.shape == (2, 4, 31, 31), out_b.shape
    assert jnp.allclose(out_b, ref_b, atol=1e-3, rtol=1e-3), \
        float(jnp.max(jnp.abs(out_b - ref_b)))

    print("KERNEL_OK")
</pallas_src>

<mosaic_0001>
module attributes {stable_mosaic.version = 11 : i64} {
  func.func @_deconv_bn_relu_kernel(%arg0: i32, %arg1: memref<16x512xf32, #tpu.memory_space<vmem>>, %arg2: memref<8x16xf32, #tpu.memory_space<vmem>>, %arg3: memref<8x1xf32, #tpu.memory_space<vmem>>, %arg4: memref<8x512xf32, #tpu.memory_space<vmem>>) attributes {dimension_semantics = [#tpu.dimension_semantics<parallel>], iteration_bounds = array<i64: 4>, scalar_prefetch = 0 : i64, scratch_operands = 0 : i64, tpu.core_type = #tpu.core_type<tc>, window_params = [{transform_indices = @transform_0, window_bounds = array<i64: 16, 512>}, {pipeline_mode = #tpu.pipeline_mode<synchronous>, transform_indices = @transform_1, window_bounds = array<i64: 8, 16>}, {pipeline_mode = #tpu.pipeline_mode<synchronous>, transform_indices = @transform_2, window_bounds = array<i64: 8, 1>}, {transform_indices = @transform_3, window_bounds = array<i64: 8, 512>}]} {
    %c0 = arith.constant 0 : index
    %c0_0 = arith.constant 0 : index
    %0 = vector.load %arg1[%c0, %c0_0] : memref<16x512xf32, #tpu.memory_space<vmem>>, vector<16x512xf32>
    %c0_1 = arith.constant 0 : index
    %c0_2 = arith.constant 0 : index
    %1 = vector.load %arg2[%c0_1, %c0_2] : memref<8x16xf32, #tpu.memory_space<vmem>>, vector<8x16xf32>
    %cst = arith.constant dense<0.000000e+00> : vector<8x512xf32>
    %2 = tpu.matmul %1, %0, %cst {dimension_numbers = #tpu.dot_dimension_numbers<[1], [0], [0], [1], [0, 0, 1, 1], [], []>} : vector<8x16xf32>, vector<16x512xf32>, vector<8x512xf32> -> vector<8x512xf32>
    %c0_3 = arith.constant 0 : index
    %c0_4 = arith.constant 0 : index
    %3 = vector.load %arg3[%c0_3, %c0_4] : memref<8x1xf32, #tpu.memory_space<vmem>>, vector<8x1xf32>
    %4 = vector.broadcast %3 : vector<8x1xf32> to vector<8x512xf32>
    %5 = arith.addf %2, %4 : vector<8x512xf32>
    %cst_5 = arith.constant 0.000000e+00 : f32
    %6 = vector.broadcast %cst_5 : f32 to vector<8x512xf32>
    %7 = arith.maximumf %5, %6 : vector<8x512xf32>
    %c0_6 = arith.constant 0 : index
    %c0_7 = arith.constant 0 : index
    %8 = vector.load %arg4[%c0_6, %c0_7] : memref<8x512xf32, #tpu.memory_space<vmem>>, vector<8x512xf32>
    tpu.vector_store %arg4[%c0_6, %c0_7], %7 {strides = array<i32>} : memref<8x512xf32, #tpu.memory_space<vmem>>, vector<8x512xf32>,
    return
  }
  func.func @transform_0(%arg0: i32) -> (i32, i32) {
    %c0_i32 = arith.constant 0 : i32
    %c0_i32_0 = arith.constant 0 : i32
    return %c0_i32, %arg0 : i32, i32
  }
  func.func @transform_1(%arg0: i32) -> (i32, i32) {
    %c0_i32 = arith.constant 0 : i32
    %c0_i32_0 = arith.constant 0 : i32
    %c0_i32_1 = arith.constant 0 : i32
    return %c0_i32, %c0_i32_0 : i32, i32
  }
  func.func @transform_2(%arg0: i32) -> (i32, i32) {
    %c0_i32 = arith.constant 0 : i32
    %c0_i32_0 = arith.constant 0 : i32
    %c0_i32_1 = arith.constant 0 : i32
    return %c0_i32, %c0_i32_0 : i32, i32
  }
  func.func @transform_3(%arg0: i32) -> (i32, i32) {
    %c0_i32 = arith.constant 0 : i32
    %c0_i32_0 = arith.constant 0 : i32
    return %c0_i32, %arg0 : i32, i32
  }
}

</mosaic_0001>

<bundles_post_ra>
// kernel: tpu_custom_call.1
= control target key start
LH: loop header
LB: loop body
LE: loop exit
PB: predicated region body
PF: predicated region fallthrough
CT: control target
= control target key end

     0   :  { %8 = vsyncpa [#allocation3], 0  ;;  %s789_s0 = inlined_call_operand.hbm [shape: f32[16,2048], index: 0, kind: input, shape index: {}]   ;;  %s790_s1 = inlined_call_operand.vmem [shape: f32[8,16], index: 1, kind: input, shape index: {}]   ;;  %s791_s2 = inlined_call_operand.vmem [shape: f32[8,1], index: 2, kind: input, shape index: {}]   ;;  %s792_s3 = inlined_call_operand.hbm [shape: f32[8,2048], index: 3, kind: output, shape index: {}]  }
   0x1   :  { %10 = vsyncpa [#allocation3 + $0x1], 0 }
   0x2   :  { %11 = vsyncpa [#allocation4], 0 }
   0x3   :  { %13 = vsyncpa [#allocation4 + $0x1], 0  ;;  %s636_s12 = smov 0   ;;  %s638_s13 = smov 0  }
   0x4   :  { %s640_s14 = smov 0   ;;  %s642_s15 = smov 0  }
   0x5 LB: > { %s657_s16 = sadd.s32 4294967295, %s607_s15   ;;  %s445_s17 = sadd.s32 4294967294, %s607_s15   ;;  %s607_s15 = sphi %s642_s15, %s807_s15   ;;  %s603_s14 = sphi %s640_s14, %s806_s14   ;;  %s599_s13 = sphi %s638_s13, %s805_s13   ;;  %s595_s12 = sphi %s636_s12, %s804_s12  }
   0x6   : > { %s661_s18 = sadd.s32 1, %s607_s15   ;;  %s26_s19 = sadd.s32 1, %s603_s14 }
   0x7   : > { %s23_s20 = ssub.s32 %s607_s15, %s661_s18  ;;  %p33_p0 = scmp.ne.s32.totalorder %s603_s14, %s599_s13 }
   0x8   : > { %p24_p1 = scmp.eq.s32.totalorder %s23_s20, 0  ;;  %p34_p2 = scmp.eq.s32.totalorder %s607_s15, 0 }
   0x9   : > { %p39_p3 = scmp.ne.s32.totalorder %s599_s13, %s595_s12  ;;  %p40_p4 = scmp.eq.s32.totalorder %s657_s16, 0 }
   0xa   : > { %s673_s21 = scalar_select %p24_p1, %s603_s14, %s26_s19  }
   0xb   : > { %p675_p5 = por %p34_p2, %p33_p0  ;;  %p679_p6 = por %p40_p4, %p39_p3 }
   0xc   : > { %p105_p7 = scmp.eq.s32.totalorder %s657_s16, 3  ;;  %p111_p8 = scmp.eq.s32.totalorder %s445_s17, 3 }
   0xd   : > { %s796_s23 = scalar_select %p679_p6, 1, 0 }
   0xe   : > { %p475_p9 = scmp.lt.s32.totalorder %s607_s15, 4  ;;  %p685_p10 = por %p105_p7, %p33_p0 }
   0xf   : > { %p689_p11 = por %p111_p8, %p39_p3  ;;  %s137_s26 = sand.u32 1, %s603_s14  }
  0x10   : > { %s797_s24 = scalar_select %p685_p10, 1, 0 }
  0x11   : > { %s798_s25 = scalar_select %p689_p11, 1, 0 }
  0x12   : > { %s461_s27 = sshll.u32 %s607_s15, 9  ;;  %s448_s28 = sshll.u32 %s137_s26, 6 }
  0x13   : > { %s698_s4 = scalar_lea.hbm %s789_s0, %s461_s27  ;;  %s141_s5 = scalar_lea.vmem [#allocation2], %s448_s28 }
  0x14   : > { %s148_s6 = sshll.u32 %s141_s5, 4  ;;  %p702_p12 = pnand %p475_p9, %p675_p5  ;;  %s706_s6 = int_to_ptr.vmem [resolvable:$true] %s148_s6 }
  0x15   : > { %s709_s8 = scalar_lea.sflag [#allocation3], %s137_s26  ;;  %s515_s9 = scalar_lea.hbm %s698_s4, 1024 }
  0x16   : > { %p516_p0 = scmp.ne.s32.totalorder %s698_s4, %s515_s9  ;;  %p517_p1 = pneg %p702_p12 }
  0x17   : > { %s520_s17 = scalar_lea.hbm %s789_s0, 4096  ;;  %p521_p4 = scmp.lt.s32.totalorder %s698_s4, %s789_s0 }
  0x18   : > { %p518_p2 = pnand %p517_p1, %p516_p0  ;;  %p522_p5 = scmp.lt.s32.totalorder %s520_s17, %s515_s9 }
  0x1a   : > { %p519_p3 = pneg %p518_p2  ;;  %p523_p7 = por %p522_p5, %p521_p4 }
  0x1c   : > { %p524_p8 = pnand %p523_p7, %p519_p3 }
  0x1e   : > { %527 = shalt.err (!%p524_p8)
}
  0x1f   : > { %s528_s22 = scalar_lea.vmem %s706_s6, 1024  ;;  %s609_s26 = smov [#allocation2]  }
  0x20   : > { %p529_p9 = scmp.ne.s32.totalorder %s706_s6, %s528_s22  ;;  %s533_s27 = sshll.u32 %s609_s26, 4  ;;  %s534_s27 = int_to_ptr.vmem [resolvable:$false] %s533_s27 }
  0x21   : > { %s535_s28 = scalar_lea.vmem %s534_s27, 2048  ;;  %p536_p2 = scmp.lt.s32.totalorder %s706_s6, %s534_s27 }
  0x22   : > { %p531_p13 = pnand %p529_p9, %p517_p1  ;;  %p537_p11 = scmp.lt.s32.totalorder %s535_s28, %s528_s22 }
  0x24   : > { %p532_p0 = pneg %p531_p13  ;;  %p538_p10 = por %p537_p11, %p536_p2 }
  0x26   : > { %p539_p6 = pnand %p538_p10, %p532_p0 }
  0x28   : > { %542 = shalt.err (!%p539_p6)
}
  0x29   : > { %s610_s29 = smov 2048   ;;  %s611_s30 = smov 512  }
  0x2a   : > { %s612_s5 = smov 32   ;;  %p156_p13 = scmp.lt.s32.totalorder %s607_s15, 5 }
  0x2b   : > { %470 = dma.hbm_to_vmem [thread:$0]  (!%p702_p12), %s698_s4, 1024, %s706_s6, %s709_s8, %s610_s29, %s611_s30, %s612_s5  }
  0x2c   : > { %p800_p1 = scmp.ge.s32.totalorder %s607_s15, 1 }
  0x2e   : > { %p157_p3 = pnand %p800_p1, %p156_p13 }
  0x2f   : > { %s734_s9 = sand.u32 (!%p157_p3), 1, %s599_s13   ;;  %p801_p6 = scmp.ne.s32.totalorder (!%p157_p3), %s796_s23, 0 }
  0x30   : > { %160 = sbr.rel (%p157_p3) target bundleno = 273 (0x111), region = 32  ;;  %s452_s10 = sshll.u32 (!%p157_p3), %s734_s9, 6 }
  0x31   : > { %s163_s11 = scalar_lea.sflag (!%p157_p3), [#allocation3], %s734_s9  ;;  %s166_s17 = scalar_lea.vmem (!%p157_p3), [#allocation2], %s452_s10 }
  0x35   : > { %586 = dma.done.wait (%p801_p6), %s163_s11, 1024  }
  0x36   : > { %588 = vsyncadd (%p801_p6), %s163_s11, 4294966272  ;;  %v613_v0 = vmov 0.0   ;;  %v614_v1 = vmov 0   ;;  %v196_v2 = vld [vmem:[%s166_s17 + $0x28] sm:$0xff]  ;;  %v198_v3 = vld [vmem:[%s166_s17 + $0x38] sm:$0xff]  ;;  %vm206_vm0 = vcmask 130048  }
  0x37   : > { %274 = vmatprep.mubr.f32.mxu0 %v613_v0  ;;  %345 = vmatprep.mubr.f32.mxu1 %v613_v0  ;;  %v195_v4 = vld [vmem:[%s166_s17 + $0x20] sm:$0xff]  ;;  %v197_v5 = vld [vmem:[%s166_s17 + $0x30] sm:$0xff]  ;;  %v192_v6 = vld [vmem:[%s166_s17 + $0x8] sm:$0xff]  ;;  %s453_s8 = sshll.u32 %s734_s9, 5  ;;  %s462_s19 = sshll.u32 %s657_s16, 9 }
  0x38   : > { %514 = vset.pattern.permute.xlu0 %v614_v1  ;;  %238 = vmatprep.subr.mxu0 %v196_v2  ;;  %v194_v7 = vld [vmem:[%s166_s17 + $0x18] sm:$0xff]  ;;  %v191_v8 = vld [vmem:[%s166_s17] sm:$0xff]  ;;  %v193_v9 = vld [vmem:[%s166_s17 + $0x10] sm:$0xff]  ;;  %s188_s20 = scalar_lea.vmem [#allocation5], %s453_s8  ;;  %s753_s28 = scalar_lea.hbm %s792_s3, %s462_s19 }
  0x39   : > { %309 = vmatprep.subr.mxu1 %v198_v3  ;;  %239 = vmatpush1.msra.mxu0 %v195_v4  ;;  %v199_v10 = vld [vmem:[%s790_s1] sm:$0xff]  ;;  %s375_s22 = sshll.u32 %s188_s20, 4  ;;  %s361_s16 = scalar_lea.sflag [#allocation4], %s734_s9  ;;  %s376_s22 = int_to_ptr.vmem [resolvable:$true] %s375_s22 }
  0x3a   : > { %310 = vmatpush1.msra.mxu1 %v197_v5  ;;  %240 = vmatprep.subr.mxu0 %v192_v6  ;;  %v200_v11 = vld [vmem:[%s791_s2] sm:$0xff]  ;;  %s543_s29 = scalar_lea.vmem %s376_s22, 512  ;;  %p802_p11 = scmp.ne.s32.totalorder %s797_s24, 0 }
  0x3b   : > { %311 = vmatprep.subr.mxu1 %v194_v7  ;;  %241 = vmatpush1.msra.mxu0 %v191_v8  ;;  %p544_p10 = scmp.ne.s32.totalorder %s376_s22, %s543_s29  ;;  %s615_s30 = smov [#allocation5]  }
  0x3c   : > { %312 = vmatpush1.msra.mxu1 %v193_v9  ;;  %454 = vmatmul.mubr.msk.f32.vlgmr.msra.gmra.mxu0 %vm206_vm0, %v199_v10  ;;  %s547_s5 = sshll.u32 %s615_s30, 4  ;;  %s548_s5 = int_to_ptr.vmem [resolvable:$false] %s547_s5 }
  0x3d   : > { %455 = vmatmul.mubr.msk.f32.vlgmr.msra.gmra.mxu1 %vm206_vm0, %v199_v10  ;;  %203 = vperm.xlu0 %514, %v200_v11   ;;  %p545_p12 = pnand %p544_p10, %p802_p11  ;;  %s549_s10 = scalar_lea.vmem %s548_s5, 1024 }
  0x3e   : > { %p550_p5 = scmp.lt.s32.totalorder %s376_s22, %s548_s5  ;;  %p551_p7 = scmp.lt.s32.totalorder %s549_s10, %s543_s29 }
  0x3f   : > { %p546_p4 = pneg %p545_p12 }
  0x40   : > { %p552_p8 = por %p551_p7, %p550_p5 }
  0x42   : > { %p553_p9 = pnand %p552_p8, %p546_p4 }
  0xb8   : > { %v204_v12 = vpop.permute.xlu0 %203 }
  0xfc   : > { %v276_v13 = vpop.f32.mrf.mxu0 }
  0xfd   : > { %v347_v14 = vpop.f32.mrf.mxu1  ;;  %v277_v15 = vadd.f32 %v276_v13, %v204_v12 }
  0xfe   : > { %v348_v16 = vadd.f32 %v347_v14, %v204_v12  ;;  %v278_v17 = vpop.f32.mrf.mxu0 }
  0xff   : > { %v349_v18 = vpop.f32.mrf.mxu1  ;;  %v352_v19 = vmax.f32 %v277_v15, 0.0  ;;  %v279_v21 = vadd.f32 %v278_v17, %v204_v12 }
 0x100   : > { %v354_v20 = vmax.f32 %v348_v16, 0.0  ;;  %v350_v22 = vadd.f32 %v349_v18, %v204_v12 }
 0x101   : > { %356 = vst [vmem:[%s188_s20] sm:$0xff] %v352_v19  ;;  %v353_v23 = vmax.f32 %v279_v21, 0.0 }
 0x102   : > { %358 = vst [vmem:[%s188_s20 + $0x10] sm:$0xff] %v354_v20  ;;  %v355_v24 = vmax.f32 %v350_v22, 0.0 }
 0x103   : > { %357 = vst [vmem:[%s188_s20 + $0x8] sm:$0xff] %v353_v23 }
 0x104   : > { %359 = vst [vmem:[%s188_s20 + $0x18] sm:$0xff] %v355_v24 }
 0x105   : > { %556 = shalt.err (!%p553_p9)
}
 0x106   : > { %s557_s11 = scalar_lea.hbm %s753_s28, 512  ;;  %s561_s23 = scalar_lea.hbm %s792_s3, 2048 }
 0x107   : > { %p558_p0 = scmp.ne.s32.totalorder %s753_s28, %s557_s11  ;;  %p562_p1 = scmp.lt.s32.totalorder %s753_s28, %s792_s3 }
 0x108   : > { %p563_p3 = scmp.lt.s32.totalorder %s561_s23, %s557_s11 }
 0x109   : > { %p559_p2 = pnand %p558_p0, %p802_p11 }
 0x10a   : > { %p564_p6 = por %p563_p3, %p562_p1 }
 0x10b   : > { %p560_p13 = pneg %p559_p2 }
 0x10d   : > { %p565_p10 = pnand %p564_p6, %p560_p13 }
 0x10f   : > { %568 = shalt.err (!%p565_p10)
}
 0x110   : > { %465 = dma.vmem_to_hbm [thread:$0]  (%p802_p11), %s376_s22, 512, %s753_s28, %s361_s16  }
 0x111 PF: > { %p476_p12 = scmp.ge.s32.totalorder %s607_s15, 2  ;;  %s387_s7 = sand.u32 1, %s595_s12  }
 0x112   : > { %p803_p4 = scmp.ne.s32.totalorder %s798_s25, 0  ;;  %s388_s8 = scalar_lea.sflag [#allocation4], %s387_s7 }
 0x114   : > { %p472_p5 = pnand %p476_p12, %p803_p4 }
 0x116   : > { %p473_p7 = pneg %p472_p5 }
 0x118   : > { %590 = dma.done.wait (%p473_p7), %s388_s8, 512  }
 0x119   : > { %592 = vsyncadd (%p473_p7), %s388_s8, 4294966784  ;;  %p16_p8 = scmp.ge.s32.totalorder %s661_s18, 6   ;;  %s804_s12 = smov %s599_s13 }
 0x11a   : > { %s805_s13 = smov %s603_s14  ;;  %s806_s14 = smov %s673_s21 }
 0x11b   : > { %s807_s15 = smov %s661_s18  ;;  %18 = sbr.rel (!%p16_p8) target bundleno = 5 (0x5), region = 77 }
 0x120   :  { %393 = vsyncpa [#allocation3], 1 }
 0x121   :  { %395 = vsyncpa [#allocation3 + $0x1], 1 }
 0x122   :  { %396 = vsyncpa [#allocation4], 1 }
 0x123   :  { %398 = vsyncpa [#allocation4 + $0x1], 1 }

</bundles_post_ra>
